<compile_context>
chip_gen: v6e
topology: v6e:2x2x1
jax: 0.10.0
libtpu: 0.0.40
codegen_flags: <defaults>
</compile_context>

<pallas_src>
import math

import numpy as np
import jax
import jax.numpy as jnp
from jax.experimental import pallas as pl
from jax.experimental.pallas import tpu as pltpu

LRELU_SLOPE = 0.1
ACT_DTYPE = jnp.bfloat16

LANE = 128
HALO = 128                      # right-halo block width (one 128-lane block)


def get_padding(kernel_size: int, dilation: int = 1) -> int:
    return int((kernel_size * dilation - dilation) / 2)


def _round_up(n, m):
    return (n + m - 1) // m * m


def _cdiv(a, b):
    return (a + b - 1) // b


# ----------------------------------------------------------------------------
# Per-generation VMEM / tile budgets (v5e/v6e: 128 MiB VMEM, v7x: 64 MiB).
# ----------------------------------------------------------------------------
_BUDGETS = None


def _budgets():
    """(vmem_limit_bytes, tile_byte_budget, max_time_tile)."""
    global _BUDGETS
    if _BUDGETS is None:
        vmem = 64 * 1024 * 1024
        try:
            vmem = int(getattr(pltpu.get_tpu_info(), "vmem_capacity_bytes",
                               vmem))
        except Exception:
            pass
        if vmem >= 96 * 1024 * 1024:           # v5e / v6e (128 MiB VMEM)
            _BUDGETS = (96 * 1024 * 1024, 28 * 1024 * 1024, 4096)
        else:                                   # v7x (64 MiB) or unknown
            _BUDGETS = (48 * 1024 * 1024, 14 * 1024 * 1024, 2048)
    return _BUDGETS


# ----------------------------------------------------------------------------
# Pallas kernel: a fused chain of 1..N valid 1-D convolutions over one time
# tile (+ halo), with leaky-relu pre-activations, in-chain residual adds
# (ResBlock pairs), PyTorch zero-padding edge masks, MRF residual and tanh.
# ----------------------------------------------------------------------------
def _make_chain_kernel(metas, plan, *, TT, win_off, chain_pad, n_extra,
                       post_tanh, valid_len):
    n = len(metas)
    halos = [(m["K"] - 1) * m["d"] for m in metas]
    pads = [h // 2 for h in halos]              # PyTorch same-pads (K odd)
    total_halo = sum(halos)
    halo_cols = win_off + total_halo
    snapshot_before = plan.get("snapshot_before", frozenset())
    residual_after = plan.get("residual_after", {})
    mask_after = plan.get("mask_after", frozenset())

    def kernel(*refs):
        o_ref = refs[-1]
        res_refs = refs[2 + 2 * n: 2 + 2 * n + n_extra]
        t_idx = pl.program_id(1)

        x_main = refs[0][0]                     # (C0, TT)    bf16
        if halo_cols > 0:
            x_halo = refs[1][0]                 # (C0, HALO)  bf16 (same HBM)
            window = jnp.concatenate([x_main, x_halo], axis=-1)
        else:
            window = x_main

        cur = window                            # conv 0 reads at offset `base`
        base = win_off
        w_cur = TT + total_halo                 # logical chain width
        snaps = {}
        cum = 0
        for i, m in enumerate(metas):
            if i in snapshot_before:
                snaps[i] = (cur, cum, base)

            w_ref = refs[2 + 2 * i][...]        # (cout, K*cin)  bf16
            b_ref = refs[3 + 2 * i][...]        # (cout, 1)      f32
            K, d, cin, slope = m["K"], m["d"], m["cin"], m["slope"]
            w_out = w_cur - halos[i]

            x_i = cur
            if slope is not None:
                # leaky_relu(0) == 0, so applying it after zero padding is
                # equivalent to PyTorch's order (pad the activated tensor).
                x_i = jnp.where(x_i > 0, x_i, x_i * slope)
            x_i = x_i.astype(ACT_DTYPE)

            if K == 1:
                acc = jnp.dot(w_ref, x_i[:, base:base + w_out],
                              preferred_element_type=jnp.float32)
            elif cin >= LANE:
                # Wide channels: per-tap matmuls, skip the (K*cin, w) VMEM
                # taps copy (feedback #5).
                acc = jnp.dot(w_ref[:, :cin], x_i[:, base:base + w_out],
                              preferred_element_type=jnp.float32)
                for k in range(1, K):
                    acc = acc + jnp.dot(
                        w_ref[:, k * cin:(k + 1) * cin],
                        x_i[:, base + k * d:base + k * d + w_out],
                        preferred_element_type=jnp.float32)
            else:
                taps = jnp.concatenate(
                    [x_i[:, base + k * d:base + k * d + w_out]
                     for k in range(K)], axis=0)
                acc = jnp.dot(w_ref, taps, preferred_element_type=jnp.float32)
            acc = acc + b_ref
            cum += pads[i]

            if i in residual_after:
                s_cur, s_cum, s_base = snaps[residual_after[i]]
                shift = s_base + (cum - s_cum)
                acc = acc + s_cur[:, shift:shift + w_out].astype(jnp.float32)

            if i in mask_after:
                # Zero the columns outside the real sequence so the next conv
                # sees exactly PyTorch's zero padding of its (intermediate)
                # input.  TODO(synk): gate behind an "edge tile" predicate to
                # skip this VPU work on interior tiles.
                off = chain_pad - cum
                g = (t_idx * TT - off) + jax.lax.broadcasted_iota(
                    jnp.int32, (1, w_out), 1)
                acc = jnp.where((g >= 0) & (g < valid_len), acc, 0.0)

            cur = acc
            base = 0
            w_cur = w_out

        out = cur                               # (c_last, TT) f32
        for r_ref in res_refs:
            out = out + r_ref[0].astype(jnp.float32)
        if post_tanh:
            out = jnp.tanh(out)
        o_ref[0] = out.astype(o_ref.dtype)

    return kernel


def _pick_time_tile(out_len, layer_sets, c0, n_extra):
    """Pick a 128-multiple time tile that keeps blocks + temps in VMEM."""
    _, tile_budget, max_tt = _budgets()
    per_col = 1
    for layers in layer_sets:
        c_last = layers[-1]["cout"]
        pc = 4 * c0 + 4 * c_last * (1 + n_extra) + 2 * c0   # 2-buf blocks + win
        for m in layers:
            taps = 2 * m["K"] * m["cin"] if m["cin"] < LANE else 0
            pc += taps + 8 * m["cout"]          # taps copy + f32 acc/snapshots
        per_col = max(per_col, pc)
    tt = (tile_budget // per_col) // LANE * LANE
    tt = min(tt, max_tt, _round_up(max(out_len, 1), LANE))
    return max(LANE, tt)


def _pad_for_chain(x, pad_left, TT, NT):
    """Zero-pad [B, C, T] to [B, C, NT*TT + HALO] with `pad_left` on the left."""
    B, C, T = x.shape
    pad_right = NT * TT + HALO - pad_left - T
    assert pad_right >= 0
    return jnp.pad(x.astype(ACT_DTYPE), ((0, 0), (0, 0), (pad_left, pad_right)))


def _chain_pallas(xp, layers, plan, *, TT, NT, win_off, chain_pad, valid_len,
                  extra_residual=None, post_tanh=False, out_dtype=ACT_DTYPE):
    """Run a fused conv chain on pre-padded xp = [B, C0, NT*TT + HALO].

    Returns the padded [B, c_last, NT*TT] result (caller slices to the valid
    length when leaving a stage).  Output column q of tile t corresponds to
    original time index t*TT + q.
    """
    B, C0, Lp = xp.shape
    assert Lp == NT * TT + HALO and TT % LANE == 0
    halos = [(m["K"] - 1) * m["d"] for m in layers]
    assert win_off + sum(halos) <= HALO, "receptive field must fit halo block"
    c_last = layers[-1]["cout"]
    n_extra = 0 if extra_residual is None else 1

    kernel = _make_chain_kernel(layers, plan, TT=TT, win_off=win_off,
                                chain_pad=chain_pad, n_extra=n_extra,
                                post_tanh=post_tanh, valid_len=valid_len)

    hstep = TT // HALO
    in_specs = [
        pl.BlockSpec((1, C0, TT), lambda b, t: (b, 0, t)),
        # Right halo = next 128 columns of the SAME padded buffer.
        pl.BlockSpec((1, C0, HALO), lambda b, t: (b, 0, (t + 1) * hstep)),
    ]
    args = [xp, xp]
    for m in layers:
        # TODO(synk): weight/bias blocks have constant index maps; single-
        # buffering them (pipeline_mode) would reclaim VMEM on v7x.
        in_specs.append(pl.BlockSpec(m["wf"].shape, lambda b, t: (0, 0)))
        in_specs.append(pl.BlockSpec(m["b2"].shape, lambda b, t: (0, 0)))
        args.append(m["wf"])
        args.append(m["b2"])
    if extra_residual is not None:
        assert extra_residual.shape == (B, c_last, NT * TT)
        in_specs.append(pl.BlockSpec((1, c_last, TT), lambda b, t: (b, 0, t)))
        args.append(extra_residual)

    vmem_limit, _, _ = _budgets()
    return pl.pallas_call(
        kernel,
        out_shape=jax.ShapeDtypeStruct((B, c_last, NT * TT), out_dtype),
        grid=(B, NT),
        in_specs=in_specs,
        out_specs=pl.BlockSpec((1, c_last, TT), lambda b, t: (b, 0, t)),
        compiler_params=pltpu.CompilerParams(
            dimension_semantics=("parallel", "parallel"),
            vmem_limit_bytes=vmem_limit),
    )(*args)


def _run_chain(x, layers, plan, *, pad_left, out_len, post_tanh=False,
               out_dtype=ACT_DTYPE):
    """Pad + run a single chain, slicing the output to `out_len` columns."""
    TT = _pick_time_tile(out_len, [layers], x.shape[1], 0)
    NT = max(1, _cdiv(out_len, TT))
    xp = _pad_for_chain(x, pad_left, TT, NT)
    out = _chain_pallas(xp, layers, plan, TT=TT, NT=NT, win_off=0,
                        chain_pad=pad_left, valid_len=out_len,
                        post_tanh=post_tanh, out_dtype=out_dtype)
    return out[:, :, :out_len]


# ----------------------------------------------------------------------------
# Parameter construction / preparation (weight_norm at init is identity, so
# plain PyTorch-default-init weights reproduce the module's initial forward).
# ----------------------------------------------------------------------------
def _init_conv(key, cout, cin, k):
    kw, kb = jax.random.split(key)
    s = 1.0 / math.sqrt(cin * k)
    w = jax.random.uniform(kw, (cout, cin, k), jnp.float32, -s, s)
    b = jax.random.uniform(kb, (cout,), jnp.float32, -s, s)
    return w, b


def _init_conv_transpose(key, cin, cout, k):
    kw, kb = jax.random.split(key)
    s = 1.0 / math.sqrt(cout * k)        # PyTorch fan_in for ConvTranspose1d
    w = jax.random.uniform(kw, (cin, cout, k), jnp.float32, -s, s)
    b = jax.random.uniform(kb, (cout,), jnp.float32, -s, s)
    return w, b


def _prep_layer(w, b, *, d, slope, scale=1.0):
    """(Cout, Cin, K) -> (Cout, K*Cin) bf16 weight, (Cout, 1) f32 bias."""
    w = jnp.asarray(w, jnp.float32) * scale
    cout, cin, K = w.shape
    wf = jnp.transpose(w, (0, 2, 1)).reshape(cout, K * cin).astype(ACT_DTYPE)
    b2 = jnp.asarray(b, jnp.float32).reshape(cout, 1)
    return {"wf": wf, "b2": b2, "cin": cin, "cout": cout, "K": K, "d": d,
            "slope": slope}


def _prep_upsample(w_t, b_t, *, stride, padding, scale=1.0):
    """Polyphase decomposition of ConvTranspose1d into one regular conv.

    y[:, co, u*q + r] = sum_tt F[r, co, :, tt] . x[:, q + c_min + tt], so the
    kernel computes (u*Cout) channels over the un-stuffed input and the phase
    interleave is a reshape/transpose in glue.
    """
    w_np = np.asarray(w_t, np.float32)           # (Cin, Cout, K) torch layout
    cin, cout, K = w_np.shape
    u, p = stride, padding
    infos = []
    for r in range(u):
        k_r = (K - 1 - p - r) % u
        if k_r <= K - 1:
            s_r = (K - 1 - k_r) // u + 1
            c_r = (r + k_r - (K - 1 - p)) // u   # exact integer division
            taps = [K - 1 - k_r - u * s for s in range(s_r)]
        else:
            c_r, taps = 0, []
        infos.append((c_r, taps))
    c_min = min(c for c, _ in infos)
    t_taps = max(1, max(c + len(tp) for c, tp in infos) - c_min)
    F = np.zeros((u, cout, cin, t_taps), np.float32)
    for r, (c_r, taps) in enumerate(infos):
        for s, kk in enumerate(taps):
            F[r, :, :, c_r - c_min + s] = w_np[:, :, kk].T
    w_conv = F.reshape(u * cout, cin, t_taps)
    b_conv = np.tile(np.asarray(b_t, np.float32), u)
    layer = _prep_layer(jnp.asarray(w_conv), jnp.asarray(b_conv),
                        d=1, slope=LRELU_SLOPE, scale=scale)
    return {"layer": layer, "stride": u, "cout": cout, "K": K, "p": p,
            "pad_left": max(0, -c_min), "in_shift": max(0, c_min)}


class HifiganGeneratorPallas:
    def __init__(self, in_channels, out_channels, resblock_type,
                 resblock_dilation_sizes, resblock_kernel_sizes,
                 upsample_kernel_sizes, upsample_initial_channel,
                 upsample_factors, key):
        self.num_kernels = len(resblock_kernel_sizes)
        self.num_upsamples = len(upsample_factors)
        nk = self.num_kernels
        keys = iter(jax.random.split(key, 1024))

        w, b = _init_conv(next(keys), upsample_initial_channel, in_channels, 7)
        self.conv_pre = _prep_layer(w, b, d=1, slope=None)
        # TODO(synk): cond_channels / cond_in_each_up_layer branches not built
        # (module defaults: cond_channels=0, cond_in_each_up_layer=False).

        self.ups = []
        for i, (u, k) in enumerate(zip(upsample_factors, upsample_kernel_sizes)):
            cin = upsample_initial_channel // (2 ** i)
            cout = upsample_initial_channel // (2 ** (i + 1))
            w, b = _init_conv_transpose(next(keys), cin, cout, k)
            # Fold the previous stage's "/ num_kernels" MRF average into the
            # weights (not the bias) of the consumer layer: exact because
            # leaky_relu is positively homogeneous.
            scale = 1.0 if i == 0 else 1.0 / nk
            self.ups.append(_prep_upsample(w, b, stride=u,
                                           padding=(k - u) // 2, scale=scale))

        # One fully fused chain per (stage, MRF branch).  For ResBlock1 that is
        # the whole block: 3 pairs of convs, residual add after each pair,
        # PyTorch zero-pad masks on every intermediate.
        self.stages = []
        ch = upsample_initial_channel
        for i in range(self.num_upsamples):
            ch = upsample_initial_channel // (2 ** (i + 1))
            branches = []
            for k, dils in zip(resblock_kernel_sizes, resblock_dilation_sizes):
                layers, pad_left = [], 0
                if resblock_type == "1":
                    for d in dils:
                        w1, b1 = _init_conv(next(keys), ch, ch, k)
                        w2, b2 = _init_conv(next(keys), ch, ch, k)
                        layers.append(_prep_layer(w1, b1, d=d, slope=LRELU_SLOPE))
                        layers.append(_prep_layer(w2, b2, d=1, slope=LRELU_SLOPE))
                        pad_left += get_padding(k, d) + get_padding(k, 1)
                    n = len(layers)
                    plan = {"snapshot_before": frozenset(range(0, n, 2)),
                            "residual_after": {j + 1: j for j in range(0, n, 2)},
                            "mask_after": frozenset(range(n - 1))}
                else:
                    for d in dils:
                        w1, b1 = _init_conv(next(keys), ch, ch, k)
                        layers.append(_prep_layer(w1, b1, d=d, slope=LRELU_SLOPE))
                        pad_left += get_padding(k, d)
                    n = len(layers)
                    plan = {"snapshot_before": frozenset(range(n)),
                            "residual_after": {j: j for j in range(n)},
                            "mask_after": frozenset(range(n - 1))}
                branches.append({"layers": layers, "plan": plan,
                                 "pad_left": pad_left})
            self.stages.append(branches)

        w, b = _init_conv(next(keys), out_channels, ch, 7)
        post_scale = (1.0 / nk) if self.num_upsamples > 0 else 1.0
        # F.leaky_relu default slope (0.01) before conv_post.
        self.conv_post = _prep_layer(w, b, d=1, slope=0.01, scale=post_scale)

    # ------------------------------------------------------------------ stages
    def _apply_upsample(self, up, o):
        B, _, T = o.shape
        u, K, p, cout = up["stride"], up["K"], up["p"], up["cout"]
        tout = (T - 1) * u + K - 2 * p           # ConvTranspose1d output length
        q = _cdiv(tout, u)
        x_eff = o[:, :, up["in_shift"]:] if up["in_shift"] else o
        yp = _run_chain(x_eff, [up["layer"]], {}, pad_left=up["pad_left"],
                        out_len=q, out_dtype=ACT_DTYPE)
        # Phase de-interleave: one cheap XLA transpose per stage.
        # TODO(synk): could be folded into the next stage's first conv
        # (phase-major consumption) to save one HBM round trip.
        y = jnp.transpose(yp.reshape(B, u, cout, q), (0, 2, 3, 1))
        return y.reshape(B, cout, q * u)[:, :, :tout]

    def _apply_mrf(self, branches, o):
        """All MRF branches of one stage share a single padded input buffer;
        each branch is one fused-ResBlock pallas_call that also accumulates
        the running z_sum (extra residual)."""
        B, C, T = o.shape
        pad_shared = max(br["pad_left"] for br in branches)
        for br in branches:
            assert pad_shared + br["pad_left"] <= HALO
        TT = _pick_time_tile(T, [br["layers"] for br in branches], C, 1)
        NT = max(1, _cdiv(T, TT))
        xp = _pad_for_chain(o, pad_shared, TT, NT)      # one pad per stage
        z = None
        for br in branches:
            z = _chain_pallas(xp, br["layers"], br["plan"], TT=TT, NT=NT,
                              win_off=pad_shared - br["pad_left"],
                              chain_pad=br["pad_left"], valid_len=T,
                              extra_residual=z, out_dtype=ACT_DTYPE)
        # "/ num_kernels" is folded into the next consumer's weights.
        return z[:, :, :T]

    # ----------------------------------------------------------------- forward
    def forward(self, x):
        T = x.shape[2]
        o = _run_chain(x, [self.conv_pre], {}, pad_left=3, out_len=T)
        for i in range(self.num_upsamples):
            o = self._apply_upsample(self.ups[i], o)
            o = self._apply_mrf(self.stages[i], o)
        o = _run_chain(o, [self.conv_post], {}, pad_left=3, out_len=o.shape[2],
                       post_tanh=True, out_dtype=jnp.float32)
        return o


if __name__ == "__main__":
    key = jax.random.PRNGKey(0)
    kp, kx = jax.random.split(key)

    B, in_channels, T = 2, 4, 8
    gen = HifiganGeneratorPallas(
        in_channels=in_channels,
        out_channels=1,
        resblock_type="1",
        resblock_dilation_sizes=[[1, 3, 5], [1, 3, 5]],
        resblock_kernel_sizes=[3, 5],
        upsample_kernel_sizes=[4, 4],
        upsample_initial_channel=16,
        upsample_factors=[2, 2],
        key=kp,
    )

    x = jax.random.normal(kx, (B, in_channels, T), jnp.float32)
    out = jax.block_until_ready(gen.forward(x))
    assert out.shape == (B, 1, T * 2 * 2), out.shape
    assert bool(jnp.all(jnp.isfinite(out)))
    print("KERNEL_OK")
</pallas_src>

<mosaic_0001>
module attributes {stable_mosaic.version = 11 : i64} {
  func.func @kernel(%arg0: i32, %arg1: i32, %arg2: memref<1x4x128xbf16, #tpu.memory_space<vmem>>, %arg3: memref<1x4x128xbf16, #tpu.memory_space<vmem>>, %arg4: memref<16x28xbf16, #tpu.memory_space<vmem>>, %arg5: memref<16x1xf32, #tpu.memory_space<vmem>>, %arg6: memref<1x16x128xbf16, #tpu.memory_space<vmem>>) attributes {dimension_semantics = [#tpu.dimension_semantics<parallel>, #tpu.dimension_semantics<parallel>], iteration_bounds = array<i64: 2, 1>, scalar_prefetch = 0 : i64, scratch_operands = 0 : i64, tpu.core_type = #tpu.core_type<tc>, window_params = [{transform_indices = @transform_0, window_bounds = array<i64: 1, 4, 128>}, {transform_indices = @transform_1, window_bounds = array<i64: 1, 4, 128>}, {pipeline_mode = #tpu.pipeline_mode<synchronous>, transform_indices = @transform_2, window_bounds = array<i64: 16, 28>}, {pipeline_mode = #tpu.pipeline_mode<synchronous>, transform_indices = @transform_3, window_bounds = array<i64: 16, 1>}, {transform_indices = @transform_4, window_bounds = array<i64: 1, 16, 128>}]} {
    %c0 = arith.constant 0 : index
    %c0_0 = arith.constant 0 : index
    %c0_1 = arith.constant 0 : index
    %0 = vector.load %arg2[%c0, %c0_0, %c0_1] : memref<1x4x128xbf16, #tpu.memory_space<vmem>>, vector<1x4x128xbf16>
    %1 = vector.shape_cast %0 : vector<1x4x128xbf16> to vector<4x128xbf16>
    %c0_2 = arith.constant 0 : index
    %c0_3 = arith.constant 0 : index
    %c0_4 = arith.constant 0 : index
    %2 = vector.load %arg3[%c0_2, %c0_3, %c0_4] : memref<1x4x128xbf16, #tpu.memory_space<vmem>>, vector<1x4x128xbf16>
    %3 = vector.shape_cast %2 : vector<1x4x128xbf16> to vector<4x128xbf16>
    %4 = tpu.concatenate %1, %3 in 1 : vector<4x128xbf16>, vector<4x128xbf16> -> vector<4x256xbf16>
    %c0_5 = arith.constant 0 : index
    %c0_6 = arith.constant 0 : index
    %5 = vector.load %arg4[%c0_5, %c0_6] : memref<16x28xbf16, #tpu.memory_space<vmem>>, vector<16x28xbf16>
    %c0_7 = arith.constant 0 : index
    %c0_8 = arith.constant 0 : index
    %6 = vector.load %arg5[%c0_7, %c0_8] : memref<16x1xf32, #tpu.memory_space<vmem>>, vector<16x1xf32>
    %7 = vector.extract_strided_slice %4 {offsets = [0, 0], sizes = [4, 128], strides = [1, 1]} : vector<4x256xbf16> to vector<4x128xbf16>
    %8 = vector.extract_strided_slice %4 {offsets = [0, 1], sizes = [4, 128], strides = [1, 1]} : vector<4x256xbf16> to vector<4x128xbf16>
    %9 = vector.extract_strided_slice %4 {offsets = [0, 2], sizes = [4, 128], strides = [1, 1]} : vector<4x256xbf16> to vector<4x128xbf16>
    %10 = vector.extract_strided_slice %4 {offsets = [0, 3], sizes = [4, 128], strides = [1, 1]} : vector<4x256xbf16> to vector<4x128xbf16>
    %11 = vector.extract_strided_slice %4 {offsets = [0, 4], sizes = [4, 128], strides = [1, 1]} : vector<4x256xbf16> to vector<4x128xbf16>
    %12 = vector.extract_strided_slice %4 {offsets = [0, 5], sizes = [4, 128], strides = [1, 1]} : vector<4x256xbf16> to vector<4x128xbf16>
    %13 = vector.extract_strided_slice %4 {offsets = [0, 6], sizes = [4, 128], strides = [1, 1]} : vector<4x256xbf16> to vector<4x128xbf16>
    %14 = tpu.concatenate %7, %8, %9, %10, %11, %12, %13 in 0 : vector<4x128xbf16>, vector<4x128xbf16>, vector<4x128xbf16>, vector<4x128xbf16>, vector<4x128xbf16>, vector<4x128xbf16>, vector<4x128xbf16> -> vector<28x128xbf16>
    %cst = arith.constant dense<0.000000e+00> : vector<16x128xf32>
    %15 = tpu.matmul %5, %14, %cst {dimension_numbers = #tpu.dot_dimension_numbers<[1], [0], [0], [1], [0, 0, 1, 1], [], []>} : vector<16x28xbf16>, vector<28x128xbf16>, vector<16x128xf32> -> vector<16x128xf32>
    %16 = vector.broadcast %6 : vector<16x1xf32> to vector<16x128xf32>
    %17 = arith.addf %15, %16 : vector<16x128xf32>
    %18 = arith.truncf %17 : vector<16x128xf32> to vector<16x128xbf16>
    %c0_9 = arith.constant 0 : index
    %c0_10 = arith.constant 0 : index
    %c0_11 = arith.constant 0 : index
    %19 = vector.load %arg6[%c0_9, %c0_10, %c0_11] : memref<1x16x128xbf16, #tpu.memory_space<vmem>>, vector<1x16x128xbf16>
    %20 = vector.shape_cast %19 : vector<1x16x128xbf16> to vector<16x128xbf16>
    %21 = vector.shape_cast %18 : vector<16x128xbf16> to vector<1x16x128xbf16>
    tpu.vector_store %arg6[%c0_9, %c0_10, %c0_11], %21 {strides = array<i32>} : memref<1x16x128xbf16, #tpu.memory_space<vmem>>, vector<1x16x128xbf16>,
    return
  }
  func.func @transform_0(%arg0: i32, %arg1: i32) -> (i32, i32, i32) {
    %c0_i32 = arith.constant 0 : i32
    %c0_i32_0 = arith.constant 0 : i32
    return %arg0, %c0_i32, %arg1 : i32, i32, i32
  }
  func.func @transform_1(%arg0: i32, %arg1: i32) -> (i32, i32, i32) {
    %c1_i32 = arith.constant 1 : i32
    %0 = arith.addi %arg1, %c1_i32 : i32
    %c1_i32_0 = arith.constant 1 : i32
    %1 = arith.muli %0, %c1_i32_0 : i32
    %c0_i32 = arith.constant 0 : i32
    %c0_i32_1 = arith.constant 0 : i32
    return %arg0, %c0_i32, %1 : i32, i32, i32
  }
  func.func @transform_2(%arg0: i32, %arg1: i32) -> (i32, i32) {
    %c0_i32 = arith.constant 0 : i32
    %c0_i32_0 = arith.constant 0 : i32
    %c0_i32_1 = arith.constant 0 : i32
    return %c0_i32, %c0_i32_0 : i32, i32
  }
  func.func @transform_3(%arg0: i32, %arg1: i32) -> (i32, i32) {
    %c0_i32 = arith.constant 0 : i32
    %c0_i32_0 = arith.constant 0 : i32
    %c0_i32_1 = arith.constant 0 : i32
    return %c0_i32, %c0_i32_0 : i32, i32
  }
  func.func @transform_4(%arg0: i32, %arg1: i32) -> (i32, i32, i32) {
    %c0_i32 = arith.constant 0 : i32
    %c0_i32_0 = arith.constant 0 : i32
    return %arg0, %c0_i32, %arg1 : i32, i32, i32
  }
}

</mosaic_0001>

<bundles_post_ra>
// kernel: tpu_custom_call.1
= control target key start
LH: loop header
LB: loop body
LE: loop exit
PB: predicated region body
PF: predicated region fallthrough
CT: control target
= control target key end

     0   :  { %9 = vsyncpa [#allocation3], 0  ;;  %s967_s0 = inlined_call_operand.vmem [shape: bf16[2,4,256], index: 0, kind: input, shape index: {}]   ;;  %s968_s1 = inlined_call_operand.vmem [shape: bf16[2,4,256], index: 1, kind: input, shape index: {}]   ;;  %s969_s2 = inlined_call_operand.hbm [shape: bf16[16,28], index: 2, kind: input, shape index: {}]   ;;  %s970_s3 = inlined_call_operand.vmem [shape: f32[16,1], index: 3, kind: input, shape index: {}]   ;;  %s971_s4 = inlined_call_operand.hbm [shape: bf16[2,16,128], index: 4, kind: output, shape index: {}]  }
   0x1   :  { %10 = vsyncpa [#allocation4], 0 }
   0x2   :  { %12 = vsyncpa [#allocation4 + $0x1], 0  ;;  %s810_s15 = smov 0   ;;  %s812_s16 = smov 0  }
   0x3   :  { %s814_s17 = smov 0   ;;  %s816_s18 = smov 0  }
   0x4   :  { %s818_s19 = smov 0   ;;  %s820_s20 = smov 0  }
   0x5 LB: > { %s536_s21 = sadd.s32 4294967295, %s768_s20   ;;  %s537_s22 = sadd.s32 4294967294, %s768_s20   ;;  %s768_s20 = sphi %s820_s20, %s18_s20   ;;  %s764_s19 = sphi %s818_s19, %s980_s19   ;;  %s760_s18 = sphi %s816_s18, %s979_s18   ;;  %s756_s17 = sphi %s814_s17, %s978_s17   ;;  %s752_s16 = sphi %s812_s16, %s977_s16   ;;  %s748_s15 = sphi %s810_s15, %s976_s15  }
   0x6   : > { %s30_s23 = sadd.s32 1, %s764_s19  ;;  %s139_s24 = sadd.s32 1, %s756_s17 }
   0x7   : > { %p32_p0 = scmp.ge.s32.totalorder %s30_s23, 2  ;;  %p149_p1 = scmp.ne.s32.totalorder %s756_s17, %s752_s16 }
   0x8   : > { %p150_p2 = scmp.eq.s32.totalorder %s536_s21, 1  ;;  %p155_p3 = scmp.ne.s32.totalorder %s752_s16, %s748_s15 }
   0x9   : > { %s982_s23 = smov (%p32_p0, %s30_s23), 0  ;;  %p156_p5 = scmp.eq.s32.totalorder %s537_s22, 1 }
   0xa   : > { %p850_p4 = por %p150_p2, %p149_p1  ;;  %s134_s26 = ssub.s32 %s764_s19, %s982_s23 }
   0xb   : > { %p538_p6 = scmp.ge.s32.totalorder %s768_s20, 1  ;;  %p137_p7 = scmp.eq.s32.totalorder %s134_s26, 0 }
   0xc   : > { %p857_p8 = por %p156_p5, %p155_p3  ;;  %p163_p9 = scmp.lt.s32.totalorder %s768_s20, 3 }
   0xd   : > { %s863_s28 = scalar_select %p137_p7, %s756_s17, %s139_s24  }
   0xe   : > { %p865_p10 = pnand %p538_p6, %p163_p9  ;;  %p869_p11 = scmp.eq.s32.totalorder %s536_s21, 0 }
   0xf   : > { %s770_s5 = smov [#allocation2]  }
  0x10   : > { %p586_p12 = pneg %p865_p10  ;;  %s175_s6 = sshll.u32 %s770_s5, 4  ;;  %s176_s6 = int_to_ptr.vmem [resolvable:$true] %s175_s6 }
  0x11   : > { %s673_s7 = scalar_lea.vmem %s176_s6, 128  ;;  %p681_p5 = scmp.lt.s32.totalorder %s176_s6, %s176_s6 }
  0x12   : > { %p587_p13 = pnand %p869_p11, %p586_p12  ;;  %p674_p1 = scmp.ne.s32.totalorder %s176_s6, %s673_s7 }
  0x13   : > { %p682_p6 = scmp.lt.s32.totalorder %s673_s7, %s673_s7 }
  0x14   : > { %p664_p0 = pneg %p587_p13 }
  0x15   : > { %p683_p7 = por %p682_p6, %p681_p5 }
  0x16   : > { %p676_p2 = pnand %p674_p1, %p664_p0 }
  0x18   : > { %p677_p3 = pneg %p676_p2 }
  0x1a   : > { %p684_p9 = pnand %p683_p7, %p677_p3 }
  0x1c   : > { %687 = shalt.err (!%p684_p9)
}
  0x1d   : > { %s771_s8 = smov 64   ;;  %s772_s9 = smov 4  }
  0x1e   : > { %589 = dma.hbm_to_vmem [thread:$0]  (!%p587_p13), %s969_s2, 128, %s176_s6, [#allocation3], %s771_s8, %s771_s8, %s772_s9  }
  0x1f   : > { %218 = sbr.rel (%p865_p10) target bundleno = 401 (0x191), region = 36 }
  0x24   : > { %739 = dma.done.wait (%p869_p11), [#allocation3], 128  }
  0x25   : > { %741 = vsyncadd (%p869_p11), [#allocation3], 4294967168  ;;  %p256_p12 = scmp.lt.s32.totalorder %s760_s18, 1  ;;  %v773_v0 = vmov 0.0   ;;  %s774_s30 = smov 124   ;;  %vm778_vm0 = vmmov 0  }
  0x26   : > { %572 = vmatprep.subr.bf16.mxu0 %v773_v0  ;;  %s775_s6 = smov 123   ;;  %s776_s7 = smov 122   ;;  %576 = vmatprep.mubr.msk.bf16.mxu0 %vm778_vm0, %v773_v0  ;;  %v779_v7 = vmov 0   ;;  %v279_v10 = vld [vmem:[%s970_s3] sm:$0xff]  ;;  %v280_v11 = vld [vmem:[%s970_s3 + $0x8] sm:$0xff]  ;;  %vm317_vm1 = vcmask 1006592  }
  0x27   : > { %s257_s12 = scalar_select %p256_p12, %s760_s18, 1  ;;  %659 = vset.pattern.permute.xlu0 %v779_v7  ;;  %660 = vset.pattern.permute.xlu1 %v779_v7  ;;  %vm311_vm2 = vcmask 1014784   ;;  %vm323_vm3 = vcmask 998400   ;;  %vm325_vm4 = vcmask 1041408   ;;  %vm329_vm5 = vcmask 1043456   ;;  %v661_v36 = vld [vmem:[#allocation2] sm:$0xff]  }
  0x28   : > { %s777_s8 = smov 127   ;;  %s780_s9 = smov 126   ;;  %vm332_vm6 = vcmask 1045504   ;;  %vm289_vm7 = vcmask 1039360   ;;  %vm297_vm8 = vcmask 1031168   ;;  %vm305_vm9 = vcmask 1022976  }
  0x29   : > { %s557_s13 = sshll.u32 %s257_s12, 2  ;;  %s781_s10 = smov 125   ;;  %vm356_vm10 = vcmask 228352  }
  0x2a   : > { %s263_s22 = scalar_lea.vmem %s967_s0, %s557_s13  ;;  %s559_s24 = sadd.s32 2, %s557_s13 }
  0x2b   : > { %s272_s29 = scalar_lea.vmem %s968_s1, %s559_s24  ;;  %v894_v1 = vld [vmem:[%s263_s22] sm:$0x3]  ;;  %s253_s21 = sand.u32 1, %s752_s16  }
  0x2c   : > { %v276_v2 = vld [vmem:[%s272_s29] sm:$0x3]  ;;  %307 = vrot.lane.b32.xlu0 %v894_v1, %s774_s30  ;;  %v283_v3 = vrot.slane %v894_v1, 6  ;;  %v291_v5 = vrot.slane %v894_v1, 4  ;;  %v299_v8 = vrot.slane %v894_v1, 2  ;;  %s543_s22 = sshll.u32 %s253_s21, 3 }
  0x2d   : > { %v284_v4 = vrot.slane %v276_v2, 6  ;;  %v292_v6 = vrot.slane %v276_v2, 4  ;;  %v300_v9 = vrot.slane %v276_v2, 2  ;;  %s255_s24 = scalar_lea.vmem [#allocation5], %s543_s22  ;;  %s562_s5 = sshll.u32 %s760_s18, 7 }
  0x2e   : > { %313 = vrot.lane.b32.xlu1 %v283_v3, %s775_s6  ;;  %s428_s26 = sshll.u32 %s255_s24, 4  ;;  %s782_s18 = smov [#allocation5]   ;;  %s915_s26 = int_to_ptr.vmem [resolvable:$true] %s428_s26 }
  0x30   : > { %309 = vrot.lane.b32.xlu0 %v276_v2, %s774_s30 }
  0x32   : > { %315 = vrot.lane.b32.xlu1 %v284_v4, %s775_s6  ;;  %s920_s6 = scalar_lea.hbm %s971_s4, %s562_s5 }
  0x34   : > { %319 = vrot.lane.b32.xlu0 %v291_v5, %s776_s7 }
  0x36   : > { %321 = vrot.lane.b32.xlu1 %v292_v6, %s776_s7  ;;  %s922_s7 = scalar_lea.sflag [#allocation4], %s253_s21 }
  0x38   : > { %285 = vrot.lane.b32.xlu0 %v283_v3, %s777_s8 }
  0x3a   : > { %287 = vrot.lane.b32.xlu1 %v284_v4, %s777_s8  ;;  %s688_s8 = scalar_lea.vmem %s915_s26, 128 }
  0x3b   : > { %p689_p10 = scmp.ne.s32.totalorder %s915_s26, %s688_s8 }
  0x3c   : > { %293 = vrot.lane.b32.xlu0 %v291_v5, %s780_s9 }
  0x3d   : > { %p690_p11 = pnand %p689_p10, %p850_p4 }
  0x3e   : > { %295 = vrot.lane.b32.xlu1 %v292_v6, %s780_s9  ;;  %s692_s9 = sshll.u32 %s782_s18, 4  ;;  %s693_s9 = int_to_ptr.vmem [resolvable:$false] %s692_s9 }
  0x3f   : > { %p691_p13 = pneg %p690_p11  ;;  %p695_p0 = scmp.lt.s32.totalorder %s915_s26, %s693_s9 }
  0x40   : > { %301 = vrot.lane.b32.xlu0 %v299_v8, %s781_s10 }
  0x42   : > { %303 = vrot.lane.b32.xlu1 %v300_v9, %s781_s10  ;;  %s694_s10 = scalar_lea.vmem %s693_s9, 256 }
  0x43   : > { %p696_p1 = scmp.lt.s32.totalorder %s694_s10, %s688_s8 }
  0x44   : > { %343 = vperm.xlu0 %659, %v279_v10  }
  0x45   : > { %p697_p2 = por %p696_p1, %p695_p0 }
  0x46   : > { %348 = vperm.xlu1 %660, %v280_v11  }
  0x47   : > { %p698_p3 = pnand %p697_p2, %p691_p13 }
  0x9e   : > { %v308_v12 = vpop.permute.xlu0 %307 }
  0xa0   : > { %v314_v13 = vpop.permute.xlu1 %313 }
  0xa2   : > { %v310_v14 = vpop.permute.xlu0 %309 }
  0xa3   : > { %v312_v18 = vsel %vm311_vm2, %v308_v12, %v310_v14 }
  0xa4   : > { %v316_v15 = vpop.permute.xlu1 %315 }
  0xa5   : > { %v318_v16 = vsel %vm317_vm1, %v314_v13, %v316_v15 }
  0xa6   : > { %v320_v17 = vpop.permute.xlu0 %319  ;;  %v338_v21 = vsel %vm325_vm4, %v312_v18, %v318_v16 }
  0xa8   : > { %v322_v19 = vpop.permute.xlu1 %321 }
  0xa9   : > { %v324_v20 = vsel %vm323_vm3, %v320_v17, %v322_v19 }
  0xaa   : > { %v286_v22 = vpop.permute.xlu0 %285  ;;  %v340_v23 = vsel %vm329_vm5, %v338_v21, %v324_v20 }
  0xab   : > { %v360_v24 = vsel %vm332_vm6, %v340_v23, 0 }
  0xac   : > { %573 = vmatpush3.bf16.msra.mxu0 %v360_v24  ;;  %v288_v25 = vpop.permute.xlu1 %287 }
  0xad   : > { %574 = vmatprep.subr.bf16.mxu0 %v773_v0  ;;  %v290_v28 = vsel %vm289_vm7, %v286_v22, %v288_v25 }
  0xae   : > { %v294_v26 = vpop.permute.xlu0 %293  ;;  %v328_v31 = vsel %vm325_vm4, %v894_v1, %v290_v28 }
  0xb0   : > { %v296_v27 = vpop.permute.xlu1 %295 }
  0xb1   : > { %v298_v29 = vsel %vm297_vm8, %v294_v26, %v296_v27 }
  0xb2   : > { %v302_v30 = vpop.permute.xlu0 %301  ;;  %v331_v34 = vsel %vm329_vm5, %v328_v31, %v298_v29 }
  0xb4   : > { %v304_v32 = vpop.permute.xlu1 %303 }
  0xb5   : > { %v306_v33 = vsel %vm305_vm9, %v302_v30, %v304_v32 }
  0xb6   : > { %v334_v35 = vsel %vm332_vm6, %v331_v34, %v306_v33 }
  0xb7   : > { %575 = vmatpush3.bf16.msra.mxu0 %v334_v35 }
  0xba   : > { %577 = vmatmul.mubr.msk.bf16.vlgmr.msra.gmra.mxu0 %vm356_vm10, %v661_v36 }
  0xbf   : > { %v344_v38 = vpop.permute.xlu0 %343 }
  0xc1   : > { %v349_v40 = vpop.permute.xlu1 %348 }
 0x17a   : > { %v396_v37 = vpop.f32.mrf.mxu0 }
 0x17b   : > { %v397_v42 = vadd.f32 %v396_v37, %v344_v38 }
 0x17c   : > { %v578_v39 = vpop.f32.mrf.mxu0 }
 0x17e   : > { %v399_v41 = vpop.f32.mrf.mxu0 }
 0x17f   : > { %v400_v43 = vadd.f32 %v399_v41, %v349_v40 }
 0x180   : > { %v579_v44 = vpop.f32.mrf.mxu0 }
 0x181   : > { %v566_v45 = vpack.c.bf16 %v400_v43, %v397_v42 }
 0x183   : > { %567 = vst [vmem:[%s255_s24] sm:$0xff] %v566_v45  }
 0x184   : > { %701 = shalt.err (!%p698_p3)
}
 0x185   : > { %s702_s11 = scalar_lea.hbm %s920_s6, 128  ;;  %s706_s14 = scalar_lea.hbm %s971_s4, 256 }
 0x186   : > { %p703_p5 = scmp.ne.s32.totalorder %s920_s6, %s702_s11  ;;  %p707_p9 = scmp.lt.s32.totalorder %s920_s6, %s971_s4 }
 0x187   : > { %p708_p12 = scmp.lt.s32.totalorder %s706_s14, %s702_s11 }
 0x188   : > { %p704_p6 = pnand %p703_p5, %p850_p4 }
 0x189   : > { %p709_p10 = por %p708_p12, %p707_p9 }
 0x18a   : > { %p705_p7 = pneg %p704_p6 }
 0x18c   : > { %p710_p11 = pnand %p709_p10, %p705_p7 }
 0x18e   : > { %713 = shalt.err (!%p710_p11)
}
 0x18f   : > { %s783_s24 = smov 64   ;;  %s784_s5 = smov 4  }
 0x190   : > { %584 = dma.vmem_to_hbm [thread:$0]  (%p850_p4), %s915_s26, 128, %s920_s6, %s922_s7, %s783_s24, %s783_s24, %s784_s5  }
 0x191 PF: > { %p596_p13 = scmp.ge.s32.totalorder %s768_s20, 2  ;;  %s443_s29 = sand.u32 1, %s748_s15  }
 0x192   : > { %s444_s30 = scalar_lea.sflag [#allocation4], %s443_s29 }
 0x193   : > { %p591_p0 = pnand %p596_p13, %p857_p8 }
 0x195   : > { %p592_p1 = pneg %p591_p0 }
 0x197   : > { %743 = dma.done.wait (%p592_p1), %s444_s30, 128  }
 0x198   : > { %745 = vsyncadd (%p592_p1), %s444_s30, 4294967168  ;;  %s18_s20 = sadd.s32 1, %s768_s20   ;;  %s976_s15 = smov %s752_s16 }
 0x199   : > { %p15_p2 = scmp.ge.s32.totalorder %s18_s20, 4   ;;  %s977_s16 = smov %s756_s17 }
 0x19a   : > { %s978_s17 = smov %s863_s28  ;;  %s979_s18 = smov %s764_s19 }
 0x19b   : > { %s980_s19 = smov %s982_s23  ;;  %17 = sbr.rel (!%p15_p2) target bundleno = 5 (0x5), region = 79 }
 0x1a0   :  { %449 = vsyncpa [#allocation3], 1 }
 0x1a1   :  { %451 = vsyncpa [#allocation3 + $0x1], 1 }
 0x1a2   :  { %452 = vsyncpa [#allocation4], 1 }
 0x1a3   :  { %454 = vsyncpa [#allocation4 + $0x1], 1 }

</bundles_post_ra>
